<compile_context>
chip_gen: v7x
topology: tpu7x:2x2x1
jax: 0.10.0
libtpu: 0.0.40
codegen_flags: <defaults>
</compile_context>

<pallas_src>
import functools

import jax
import jax.numpy as jnp
from jax import lax
from jax.experimental import pallas as pl
from jax.experimental.pallas import tpu as pltpu

# Rules from the module's __init__ (fixed LongTensor): rows are (head, body1, body2).
RULES = ((0, 0, 0), (1, 0, 1))


def _amalgamate(x, y):
    return x + y - x * y


def _round_up(x, m):
    return ((x + m - 1) // m) * m


def make_decoder_kernel(P, K, S_pad, O_pad, rules, num_iters, dtype):
    """K = true contraction length (num_subjects == num_objects)."""
    K_pad = S_pad                       # contraction runs over the padded subject axis of t[b2]
    assert K_pad <= O_pad
    neg = float(jnp.finfo(dtype).min)   # value that can never win the max

    def kernel(t_ref, out_ref):
        # Static mask excluding padded contraction indices k >= K.  Hoisted out of the
        # iteration loop (loop-invariant; JAX does not CSE broadcasts inside loops).
        if K != K_pad:
            kmask = lax.broadcasted_iota(jnp.int32, (S_pad, K_pad, O_pad), 1) < K
        else:
            kmask = None

        def one_step(t_cur):
            outs = []
            for p in range(P):
                new = jnp.zeros((S_pad, O_pad), dtype)
                for (head, b1, b2) in rules:        # static -> unrolled at trace time
                    if head != p:
                        continue
                    a = t_cur[b1]                   # (S_pad, O_pad)
                    b = t_cur[b2]                   # (S_pad, O_pad)
                    ak = a[:, :K_pad]               # (S_pad, K_pad) static lane slice
                    # comp[s, o] = max_k min(a[s, k], b[k, o])  -- fuzzy max-min "matmul"
                    minned = jnp.minimum(ak[:, :, None], b[None, :, :])  # (S_pad,K_pad,O_pad)
                    if kmask is not None:
                        minned = jnp.where(kmask, minned, neg)
                    comp = jnp.max(minned, axis=1)  # (S_pad, O_pad)
                    new = _amalgamate(comp, new)
                outs.append(_amalgamate(t_cur[p], new))
            return jnp.stack(outs, axis=0)

        t0 = t_ref[...]
        if num_iters == 1:
            out_ref[...] = one_step(t0)
        else:
            out_ref[...] = lax.fori_loop(0, num_iters, lambda _, t: one_step(t), t0)

    return kernel


@functools.partial(jax.jit, static_argnames=("num_iters",))
def decoder_forward(t, num_iters=1):
    """Pallas equivalent of `decoder().forward(t)` applied `num_iters` times."""
    P, S, O = t.shape
    if S != O:
        raise ValueError("max-min composition requires num_subjects == num_objects")
    S_pad = max(8, _round_up(S, 8))      # sublane-aligned
    O_pad = max(128, _round_up(O, 128))  # lane-dense output -> unmasked full-vreg stores
    t_pad = jnp.pad(t, ((0, 0), (0, S_pad - S), (0, O_pad - O)))

    kernel = make_decoder_kernel(P, S, S_pad, O_pad, RULES, num_iters, t.dtype)
    out_pad = pl.pallas_call(
        kernel,
        out_shape=jax.ShapeDtypeStruct((P, S_pad, O_pad), t.dtype),
        in_specs=[pl.BlockSpec(memory_space=pltpu.MemorySpace.VMEM)],
        out_specs=pl.BlockSpec(memory_space=pltpu.MemorySpace.VMEM),
    )(t_pad)
    return out_pad[:, :S, :O]


# ----------------------------- plain-JAX reference --------------------------------------
def _decoder_reference_once(t):
    P, S, O = t.shape
    outs = []
    for p in range(P):
        new = jnp.zeros((S, O), t.dtype)
        for (head, b1, b2) in RULES:
            if head == p:
                comp = jnp.max(
                    jnp.minimum(t[b1][:, :, None], t[b2][None, :, :]), axis=1
                )
                new = _amalgamate(comp, new)
        outs.append(_amalgamate(t[p], new))
    return jnp.stack(outs)


def decoder_reference(t, num_iters=1):
    for _ in range(num_iters):
        t = _decoder_reference_once(t)
    return t


if __name__ == "__main__":
    # Module implies data of shape (num_predicates=2, num_subjects=7, num_objects=7).
    P, S, O = 2, 7, 7
    key = jax.random.PRNGKey(0)
    t = jax.random.uniform(key, (P, S, O), dtype=jnp.float32)

    # Single forward pass (matches the PyTorch module's forward exactly).
    out = jax.block_until_ready(decoder_forward(t))
    ref = decoder_reference(t)
    assert out.shape == (P, S, O)
    assert jnp.allclose(out, ref, atol=1e-5, rtol=1e-5), "Pallas output mismatch vs reference"

    # Fused forward-chaining: 3 decoder applications inside one pallas_call.
    out3 = jax.block_until_ready(decoder_forward(t, num_iters=3))
    ref3 = decoder_reference(t, num_iters=3)
    assert jnp.allclose(out3, ref3, atol=1e-5, rtol=1e-5), "Fused-iteration mismatch vs reference"

    print("KERNEL_OK")
</pallas_src>

<mosaic_0001>
module attributes {stable_mosaic.version = 11 : i64} {
  func.func @kernel(%arg0: memref<2x8x128xf32, #tpu.memory_space<vmem>>, %arg1: memref<2x8x128xf32, #tpu.memory_space<vmem>>) attributes {dimension_semantics = [], scalar_prefetch = 0 : i64, scratch_operands = 0 : i64, tpu.core_type = #tpu.core_type<tc>} {
    %0 = tpu.iota {dimensions = array<i32: 1>} : vector<8x8x128xi32>
    %c7_i32 = arith.constant 7 : i32
    %1 = vector.broadcast %c7_i32 : i32 to vector<8x8x128xi32>
    %2 = arith.cmpi slt, %0, %1 : vector<8x8x128xi32>
    %c0 = arith.constant 0 : index
    %c0_0 = arith.constant 0 : index
    %c0_1 = arith.constant 0 : index
    %3 = vector.load %arg0[%c0, %c0_0, %c0_1] : memref<2x8x128xf32, #tpu.memory_space<vmem>>, vector<2x8x128xf32>
    %cst = arith.constant 0.000000e+00 : f32
    %4 = vector.broadcast %cst : f32 to vector<8x128xf32>
    %5 = vector.extract_strided_slice %3 {offsets = [0, 0, 0], sizes = [1, 8, 128], strides = [1, 1, 1]} : vector<2x8x128xf32> to vector<1x8x128xf32>
    %6 = vector.shape_cast %5 : vector<1x8x128xf32> to vector<8x128xf32>
    %7 = vector.extract_strided_slice %3 {offsets = [0, 0, 0], sizes = [1, 8, 128], strides = [1, 1, 1]} : vector<2x8x128xf32> to vector<1x8x128xf32>
    %8 = vector.shape_cast %7 : vector<1x8x128xf32> to vector<8x128xf32>
    %9 = vector.extract_strided_slice %6 {offsets = [0, 0], sizes = [8, 8], strides = [1, 1]} : vector<8x128xf32> to vector<8x8xf32>
    %10 = vector.shape_cast %9 : vector<8x8xf32> to vector<8x8x1xf32>
    %11 = vector.shape_cast %8 : vector<8x128xf32> to vector<1x8x128xf32>
    %12 = vector.broadcast %10 : vector<8x8x1xf32> to vector<8x8x128xf32>
    %13 = vector.broadcast %11 : vector<1x8x128xf32> to vector<8x8x128xf32>
    %14 = arith.minimumf %12, %13 : vector<8x8x128xf32>
    %cst_2 = arith.constant -3.40282347E+38 : f32
    %15 = vector.broadcast %cst_2 : f32 to vector<8x8x128xf32>
    %16 = arith.select %2, %14, %15 : vector<8x8x128xi1>, vector<8x8x128xf32>
    %cst_3 = arith.constant dense<0xFF800000> : vector<8x128xf32>
    %17 = vector.multi_reduction <maximumf>, %16, %cst_3 [1] : vector<8x8x128xf32> to vector<8x128xf32>
    %18 = arith.addf %17, %4 : vector<8x128xf32>
    %19 = arith.mulf %17, %4 : vector<8x128xf32>
    %20 = arith.subf %18, %19 : vector<8x128xf32>
    %21 = vector.extract_strided_slice %3 {offsets = [0, 0, 0], sizes = [1, 8, 128], strides = [1, 1, 1]} : vector<2x8x128xf32> to vector<1x8x128xf32>
    %22 = vector.shape_cast %21 : vector<1x8x128xf32> to vector<8x128xf32>
    %23 = arith.addf %22, %20 : vector<8x128xf32>
    %24 = arith.mulf %22, %20 : vector<8x128xf32>
    %25 = arith.subf %23, %24 : vector<8x128xf32>
    %cst_4 = arith.constant 0.000000e+00 : f32
    %26 = vector.broadcast %cst_4 : f32 to vector<8x128xf32>
    %27 = vector.extract_strided_slice %3 {offsets = [0, 0, 0], sizes = [1, 8, 128], strides = [1, 1, 1]} : vector<2x8x128xf32> to vector<1x8x128xf32>
    %28 = vector.shape_cast %27 : vector<1x8x128xf32> to vector<8x128xf32>
    %29 = vector.extract_strided_slice %3 {offsets = [1, 0, 0], sizes = [1, 8, 128], strides = [1, 1, 1]} : vector<2x8x128xf32> to vector<1x8x128xf32>
    %30 = vector.shape_cast %29 : vector<1x8x128xf32> to vector<8x128xf32>
    %31 = vector.extract_strided_slice %28 {offsets = [0, 0], sizes = [8, 8], strides = [1, 1]} : vector<8x128xf32> to vector<8x8xf32>
    %32 = vector.shape_cast %31 : vector<8x8xf32> to vector<8x8x1xf32>
    %33 = vector.shape_cast %30 : vector<8x128xf32> to vector<1x8x128xf32>
    %34 = vector.broadcast %32 : vector<8x8x1xf32> to vector<8x8x128xf32>
    %35 = vector.broadcast %33 : vector<1x8x128xf32> to vector<8x8x128xf32>
    %36 = arith.minimumf %34, %35 : vector<8x8x128xf32>
    %cst_5 = arith.constant -3.40282347E+38 : f32
    %37 = vector.broadcast %cst_5 : f32 to vector<8x8x128xf32>
    %38 = arith.select %2, %36, %37 : vector<8x8x128xi1>, vector<8x8x128xf32>
    %cst_6 = arith.constant dense<0xFF800000> : vector<8x128xf32>
    %39 = vector.multi_reduction <maximumf>, %38, %cst_6 [1] : vector<8x8x128xf32> to vector<8x128xf32>
    %40 = arith.addf %39, %26 : vector<8x128xf32>
    %41 = arith.mulf %39, %26 : vector<8x128xf32>
    %42 = arith.subf %40, %41 : vector<8x128xf32>
    %43 = vector.extract_strided_slice %3 {offsets = [1, 0, 0], sizes = [1, 8, 128], strides = [1, 1, 1]} : vector<2x8x128xf32> to vector<1x8x128xf32>
    %44 = vector.shape_cast %43 : vector<1x8x128xf32> to vector<8x128xf32>
    %45 = arith.addf %44, %42 : vector<8x128xf32>
    %46 = arith.mulf %44, %42 : vector<8x128xf32>
    %47 = arith.subf %45, %46 : vector<8x128xf32>
    %48 = vector.shape_cast %25 : vector<8x128xf32> to vector<1x8x128xf32>
    %49 = vector.shape_cast %47 : vector<8x128xf32> to vector<1x8x128xf32>
    %50 = tpu.concatenate %48, %49 in 0 : vector<1x8x128xf32>, vector<1x8x128xf32> -> vector<2x8x128xf32>
    %c0_7 = arith.constant 0 : index
    %c0_8 = arith.constant 0 : index
    %c0_9 = arith.constant 0 : index
    %51 = vector.load %arg1[%c0_7, %c0_8, %c0_9] : memref<2x8x128xf32, #tpu.memory_space<vmem>>, vector<2x8x128xf32>
    tpu.vector_store %arg1[%c0_7, %c0_8, %c0_9], %50 {strides = array<i32>} : memref<2x8x128xf32, #tpu.memory_space<vmem>>, vector<2x8x128xf32>,
    return
  }
}

</mosaic_0001>

<bundles_post_ra>
// kernel: decoder_forward.1
= control target key start
LH: loop header
LB: loop body
LE: loop exit
PB: predicated region body
PF: predicated region fallthrough
CT: control target
= control target key end

     0   :  { %v8_v0 = vlaneseq  ;;  %vm165_vm1 = vcmask 1041409   ;;  %vm167_vm2 = vcmask 1042434   ;;  %vm169_vm3 = vcmask 1043459   ;;  %s424_s0 = inlined_call_operand.vmem [shape: f32[2,8,128], index: 0, kind: input, shape index: {}]   ;;  %s425_s1 = inlined_call_operand.vmem [shape: f32[2,8,128], index: 1, kind: output, shape index: {}]  }
   0x1   :  { %v311_v2 = vld [vmem:[%s424_s0] sm:$0xff]  ;;  %v332_v19 = vld [vmem:[%s424_s0 + $0x8] sm:$0xff]  ;;  %vm171_vm4 = vcmask 1044484   ;;  %vm173_vm5 = vcmask 1045509   ;;  %vm175_vm6 = vcmask 1046534   ;;  %vm177_vm7 = vcmask 1047559  }
   0x2   :  { %v306_v1 = vshrl.u32 %v8_v0, 7 }
   0x4   :  { %v29_v3 = vsub.s32 2, %v306_v1  ;;  %v15_v4 = vsub.s32 0, %v306_v1  ;;  %v36_v5 = vsub.s32 3, %v306_v1  ;;  %v22_v6 = vsub.s32 1, %v306_v1 }
   0x5   :  { %v50_v11 = vsub.s32 5, %v306_v1  ;;  %v43_v12 = vsub.s32 4, %v306_v1  ;;  %v64_v15 = vsub.s32 7, %v306_v1  ;;  %v57_v16 = vsub.s32 6, %v306_v1 }
   0x6   :  { %v30_v7 = vrot.slane %v311_v2, %v29_v3  ;;  %v16_v8 = vrot.slane %v311_v2, %v15_v4  ;;  %v37_v9 = vrot.slane %v311_v2, %v36_v5  ;;  %v23_v10 = vrot.slane %v311_v2, %v22_v6 }
   0x7   :  { %v51_v13 = vrot.slane %v311_v2, %v50_v11  ;;  %v44_v14 = vrot.slane %v311_v2, %v43_v12  ;;  %v65_v17 = vrot.slane %v311_v2, %v64_v15  ;;  %v58_v18 = vrot.slane %v311_v2, %v57_v16 }
   0x8   :  { %32 = vbcast.lane.b32.xlu1 %v30_v7, 256  ;;  %18 = vbcast.lane.b32.xlu0 %v16_v8, 256  ;;  %vm10_vm0 = vcmp.lt.s32.totalorder %v306_v1, 7 }
   0xc   :  { %39 = vbcast.lane.b32.xlu1 %v37_v9, 256  ;;  %25 = vbcast.lane.b32.xlu0 %v23_v10, 256 }
  0x10   :  { %53 = vbcast.lane.b32.xlu1 %v51_v13, 256  ;;  %46 = vbcast.lane.b32.xlu0 %v44_v14, 256 }
  0x14   :  { %67 = vbcast.lane.b32.xlu1 %v65_v17, 256  ;;  %60 = vbcast.lane.b32.xlu0 %v58_v18, 256 }
  0x7a   :  { %v33_v20 = vpop.permute.xlu1 %32  ;;  %v19_v21 = vpop.permute.xlu0 %18 }
  0x7b   :  { %v71_v22 = vmin.f32 %v33_v20, %v311_v2  ;;  %v185_v23 = vmin.f32 %v33_v20, %v332_v19  ;;  %v69_v24 = vmin.f32 %v19_v21, %v311_v2  ;;  %v183_v25 = vmin.f32 %v19_v21, %v332_v19 }
  0x7d   :  { %v79_v26 = vsel %vm10_vm0, %v71_v22, -3.4028235e+38  ;;  %v193_v27 = vsel %vm10_vm0, %v185_v23, -3.4028235e+38  ;;  %v77_v28 = vsel %vm10_vm0, %v69_v24, -3.4028235e+38 }
  0x7e   :  { %v97_v29 = vrot.slane %v79_v26, 4  ;;  %v211_v30 = vrot.slane %v193_v27, 4  ;;  %v85_v31 = vrot.slane %v77_v28, 4  ;;  %v191_v32 = vsel %vm10_vm0, %v183_v25, -3.4028235e+38  ;;  %v40_v33 = vpop.permute.xlu1 %39  ;;  %v26_v34 = vpop.permute.xlu0 %25 }
  0x7f   :  { %v199_v35 = vrot.slane %v191_v32, 4  ;;  %v72_v36 = vmin.f32 %v40_v33, %v311_v2  ;;  %v186_v37 = vmin.f32 %v40_v33, %v332_v19  ;;  %v70_v38 = vmin.f32 %v26_v34, %v311_v2 }
  0x80   :  { %v98_v39 = vmax.f32 %v79_v26, %v97_v29  ;;  %v212_v40 = vmax.f32 %v193_v27, %v211_v30  ;;  %v86_v41 = vmax.f32 %v77_v28, %v85_v31  ;;  %v184_v42 = vmin.f32 %v26_v34, %v332_v19 }
  0x81   :  { %v200_v43 = vmax.f32 %v191_v32, %v199_v35  ;;  %v80_v44 = vsel %vm10_vm0, %v72_v36, -3.4028235e+38  ;;  %v194_v45 = vsel %vm10_vm0, %v186_v37, -3.4028235e+38  ;;  %v78_v46 = vsel %vm10_vm0, %v70_v38, -3.4028235e+38 }
  0x82   :  { %v99_v47 = vrot.slane %v98_v39, 2  ;;  %v213_v48 = vrot.slane %v212_v40, 2  ;;  %v87_v49 = vrot.slane %v86_v41, 2  ;;  %v103_v50 = vrot.slane %v80_v44, 4  ;;  %v54_v15 = vpop.permute.xlu1 %53  ;;  %v47_v22 = vpop.permute.xlu0 %46 }
  0x83   :  { %v201_v51 = vrot.slane %v200_v43, 2  ;;  %v217_v52 = vrot.slane %v194_v45, 4  ;;  %v91_v53 = vrot.slane %v78_v46, 4  ;;  %v192_v54 = vsel %vm10_vm0, %v184_v42, -3.4028235e+38 }
  0x84   :  { %v100_v55 = vmax.f32 %v98_v39, %v99_v47  ;;  %v214_v56 = vmax.f32 %v212_v40, %v213_v48  ;;  %v88_v57 = vmax.f32 %v86_v41, %v87_v49  ;;  %v104_v58 = vmax.f32 %v80_v44, %v103_v50 }
  0x85   :  { %v202_v59 = vmax.f32 %v200_v43, %v201_v51  ;;  %v218_v60 = vmax.f32 %v194_v45, %v217_v52  ;;  %v92_v61 = vmax.f32 %v78_v46, %v91_v53  ;;  %v205_v62 = vrot.slane %v192_v54, 4 }
  0x86   :  { %v101_v63 = vrot.slane %v100_v55, 1  ;;  %v215_v0 = vrot.slane %v214_v56, 1  ;;  %v89_v3 = vrot.slane %v88_v57, 1  ;;  %v105_v4 = vrot.slane %v104_v58, 2  ;;  %v68_v36 = vpop.permute.xlu1 %67 }
  0x87   :  { %v203_v5 = vrot.slane %v202_v59, 1  ;;  %v219_v6 = vrot.slane %v218_v60, 2  ;;  %v93_v7 = vrot.slane %v92_v61, 2  ;;  %v206_v8 = vmax.f32 %v192_v54, %v205_v62 }
  0x88   :  { %v359_v9 = vmax.f32 %v100_v55, %v101_v63  ;;  %v216_v10 = vmax.f32 %v214_v56, %v215_v0  ;;  %v361_v11 = vmax.f32 %v88_v57, %v89_v3  ;;  %v106_v16 = vmax.f32 %v104_v58, %v105_v4 }
  0x89   :  { %v220_v12 = vmax.f32 %v218_v60, %v219_v6  ;;  %v94_v13 = vmax.f32 %v92_v61, %v93_v7  ;;  %v207_v14 = vrot.slane %v206_v8, 2  ;;  %v204_v18 = vmax.f32 %v202_v59, %v203_v5  ;;  %v61_v61 = vpop.permute.xlu0 %60 }
  0x8a   :  { %v364_v17 = vmul.f32 0.0, %v359_v9  ;;  %v257_v24 = vmul.f32 0.0, %v216_v10  ;;  %v367_v25 = vmul.f32 0.0, %v361_v11  ;;  %v107_v28 = vrot.slane %v106_v16, 1 }
  0x8b   :  { %v221_v20 = vrot.slane %v220_v12, 1  ;;  %v208_v21 = vmax.f32 %v206_v8, %v207_v14  ;;  %v95_v23 = vrot.slane %v94_v13, 1  ;;  %v74_v29 = vmin.f32 %v54_v15, %v311_v2 }
  0x8c   :  { %v188_v30 = vmin.f32 %v54_v15, %v332_v19  ;;  %v73_v31 = vmin.f32 %v47_v22, %v311_v2  ;;  %v151_v32 = vsub.f32 %v359_v9, %v364_v17  ;;  %v255_v33 = vmul.f32 0.0, %v204_v18 }
  0x8d   :  { %v222_v26 = vmax.f32 %v220_v12, %v221_v20  ;;  %v209_v27 = vrot.slane %v208_v21, 1  ;;  %v187_v35 = vmin.f32 %v47_v22, %v332_v19  ;;  %v375_v37 = vmax.f32 %v94_v13, %v95_v23 }
  0x8e   :  { %v82_v38 = vsel %vm10_vm0, %v74_v29, -3.4028235e+38  ;;  %v196_v39 = vsel %vm10_vm0, %v188_v30, -3.4028235e+38  ;;  %v81_v40 = vsel %vm10_vm0, %v73_v31, -3.4028235e+38  ;;  %v265_v41 = vsub.f32 %v216_v10, %v257_v24 }
  0x8f   :  { %v210_v34 = vmax.f32 %v208_v21, %v209_v27  ;;  %v258_v42 = vmul.f32 0.0, %v222_v26  ;;  %v115_v44 = vrot.slane %v82_v38, 4  ;;  %v229_v45 = vrot.slane %v196_v39, 4 }
  0x90   :  { %v109_v46 = vrot.slane %v81_v40, 4  ;;  %v195_v47 = vsel %vm10_vm0, %v187_v35, -3.4028235e+38  ;;  %v76_v48 = vmin.f32 %v68_v36, %v311_v2  ;;  %v263_v49 = vsub.f32 %v204_v18, %v255_v33 }
  0x91   :  { %v256_v43 = vmul.f32 0.0, %v210_v34  ;;  %v116_v51 = vmax.f32 %v82_v38, %v115_v44  ;;  %v223_v52 = vrot.slane %v195_v47, 4  ;;  %v142_v53 = vmul.f32 0.0, %v375_v37 }
  0x92   :  { %v230_v54 = vmax.f32 %v196_v39, %v229_v45  ;;  %v110_v55 = vmax.f32 %v81_v40, %v109_v46  ;;  %v84_v56 = vsel %vm10_vm0, %v76_v48, -3.4028235e+38  ;;  %v266_v57 = vsub.f32 %v222_v26, %v258_v42 }
  0x93   :  { %v264_v50 = vsub.f32 %v210_v34, %v256_v43  ;;  %v117_v59 = vrot.slane %v116_v51, 2  ;;  %v224_v60 = vmax.f32 %v195_v47, %v223_v52  ;;  %v127_v3 = vrot.slane %v84_v56, 4 }
  0x94   :  { %v231_v63 = vrot.slane %v230_v54, 2  ;;  %v111_v0 = vrot.slane %v110_v55, 2  ;;  %v190_v7 = vmin.f32 %v68_v36, %v332_v19  ;;  %v75_v13 = vmin.f32 %v61_v61, %v311_v2 }
  0x95   :  { %v279_v58 = vsel %vm165_vm1, %v264_v50, %v263_v49  ;;  %v118_v4 = vmax.f32 %v116_v51, %v117_v59  ;;  %v225_v6 = vrot.slane %v224_v60, 2  ;;  %v128_v12 = vmax.f32 %v84_v56, %v127_v3 }
  0x96   :  { %v280_v62 = vsel %vm167_vm2, %v265_v41, %v279_v58  ;;  %v232_v8 = vmax.f32 %v230_v54, %v231_v63  ;;  %v112_v10 = vmax.f32 %v110_v55, %v111_v0  ;;  %v108_v14 = vmax.f32 %v106_v16, %v107_v28 }
  0x97   :  { %v281_v5 = vsel %vm169_vm3, %v266_v57, %v280_v62  ;;  %v226_v15 = vmax.f32 %v224_v60, %v225_v6  ;;  %v198_v18 = vsel %vm10_vm0, %v190_v7, -3.4028235e+38  ;;  %v189_v20 = vmin.f32 %v61_v61, %v332_v19 }
  0x98   :  { %v233_v21 = vrot.slane %v232_v8, 1  ;;  %v113_v22 = vrot.slane %v112_v10, 1  ;;  %v129_v23 = vrot.slane %v128_v12, 2  ;;  %v241_v24 = vrot.slane %v198_v18, 4 }
  0x99   :  { %v150_v26 = vsub.f32 %v375_v37, %v142_v53  ;;  %v227_v27 = vrot.slane %v226_v15, 1  ;;  %v83_v29 = vsel %vm10_vm0, %v75_v13, -3.4028235e+38  ;;  %v197_v16 = vsel %vm10_vm0, %v189_v20, -3.4028235e+38 }
  0x9a   :  { %v119_v28 = vrot.slane %v118_v4, 1  ;;  %v234_v30 = vmax.f32 %v232_v8, %v233_v21  ;;  %v130_v31 = vmax.f32 %v128_v12, %v129_v23  ;;  %v242_v33 = vmax.f32 %v198_v18, %v241_v24 }
  0x9b   :  { %v114_v34 = vmax.f32 %v112_v10, %v113_v22  ;;  %v228_v35 = vmax.f32 %v226_v15, %v227_v27  ;;  %v121_v36 = vrot.slane %v83_v29, 4  ;;  %v235_v38 = vrot.slane %v197_v16, 4 }
  0x9c   :  { %v149_v39 = vsub.f32 %v361_v11, %v367_v25  ;;  %v260_v40 = vmul.f32 0.0, %v234_v30  ;;  %v131_v37 = vrot.slane %v130_v31, 1  ;;  %v243_v41 = vrot.slane %v242_v33, 2 }
  0x9d   :  { %v144_v42 = vmul.f32 0.0, %v108_v14  ;;  %v259_v43 = vmul.f32 0.0, %v228_v35  ;;  %v122_v44 = vmax.f32 %v83_v29, %v121_v36  ;;  %v236_v45 = vmax.f32 %v197_v16, %v235_v38 }
  0x9e   :  { %v166_v1 = vsel %vm165_vm1, %v150_v26, %v149_v39  ;;  %v120_v46 = vmax.f32 %v118_v4, %v119_v28  ;;  %v268_v47 = vsub.f32 %v234_v30, %v260_v40  ;;  %v244_v48 = vmax.f32 %v242_v33, %v243_v41 }
  0x9f   :  { %v145_v49 = vmul.f32 0.0, %v114_v34  ;;  %v267_v50 = vsub.f32 %v228_v35, %v259_v43  ;;  %v123_v51 = vrot.slane %v122_v44, 2  ;;  %v237_v52 = vrot.slane %v236_v45, 2 }
  0xa0   :  { %v132_v53 = vmax.f32 %v130_v31, %v131_v37  ;;  %v245_v54 = vrot.slane %v244_v48, 1  ;;  %v168_v11 = vsel %vm167_vm2, %v151_v32, %v166_v1  ;;  %v152_v57 = vsub.f32 %v108_v14, %v144_v42 }
  0xa1   :  { %v282_v25 = vsel %vm171_vm4, %v267_v50, %v281_v5  ;;  %v124_v55 = vmax.f32 %v122_v44, %v123_v51  ;;  %v238_v56 = vmax.f32 %v236_v45, %v237_v52  ;;  %v146_v58 = vmul.f32 0.0, %v120_v46 }
  0xa2   :  { %v246_v59 = vmax.f32 %v244_v48, %v245_v54  ;;  %v283_v60 = vsel %vm173_vm5, %v268_v47, %v282_v25  ;;  %v153_v61 = vsub.f32 %v114_v34, %v145_v49  ;;  %v170_v0 = vsel %vm169_vm3, %v152_v57, %v168_v11 }
  0xa3   :  { %v125_v62 = vrot.slane %v124_v55, 1  ;;  %v239_v63 = vrot.slane %v238_v56, 1  ;;  %v148_v3 = vmul.f32 0.0, %v132_v53  ;;  %v154_v17 = vsub.f32 %v120_v46, %v146_v58 }
  0xa4   :  { %v262_v4 = vmul.f32 0.0, %v246_v59  ;;  %v172_v32 = vsel %vm171_vm4, %v153_v61, %v170_v0 }
  0xa5   :  { %v126_v6 = vmax.f32 %v124_v55, %v125_v62  ;;  %v240_v9 = vmax.f32 %v238_v56, %v239_v63  ;;  %v156_v8 = vsub.f32 %v132_v53, %v148_v3  ;;  %v174_v14 = vsel %vm173_vm5, %v154_v17, %v172_v32 }
  0xa6   :  { %v270_v10 = vsub.f32 %v246_v59, %v262_v4 }
  0xa7   :  { %v147_v5 = vmul.f32 0.0, %v126_v6  ;;  %v261_v7 = vmul.f32 0.0, %v240_v9 }
  0xa9   :  { %v155_v12 = vsub.f32 %v126_v6, %v147_v5  ;;  %v269_v13 = vsub.f32 %v240_v9, %v261_v7 }
  0xab   :  { %v176_v15 = vsel %vm175_vm6, %v155_v12, %v174_v14  ;;  %v284_v18 = vsel %vm175_vm6, %v269_v13, %v283_v60 }
  0xac   :  { %v178_v20 = vsel %vm177_vm7, %v156_v8, %v176_v15  ;;  %v285_v21 = vsel %vm177_vm7, %v270_v10, %v284_v18 }
  0xad   :  { %v180_v22 = vadd.f32 %v178_v20, %v311_v2  ;;  %v181_v23 = vmul.f32 %v178_v20, %v311_v2  ;;  %v287_v24 = vadd.f32 %v285_v21, %v332_v19  ;;  %v288_v26 = vmul.f32 %v285_v21, %v332_v19 }
  0xaf   :  { %v182_v27 = vsub.f32 %v180_v22, %v181_v23  ;;  %v289_v29 = vsub.f32 %v287_v24, %v288_v26 }
  0xb1   :  { %290 = vst [vmem:[%s425_s1] sm:$0xff] %v182_v27  ;;  %291 = vst [vmem:[%s425_s1 + $0x8] sm:$0xff] %v289_v29 }

</bundles_post_ra>
